<compile_context>
chip_gen: v7x
topology: tpu7x:2x2x1
jax: 0.10.0
libtpu: 0.0.40
codegen_flags: <defaults>
</compile_context>

<pallas_src>
import functools
import math

import jax
import jax.numpy as jnp
from jax.experimental import pallas as pl
from jax.experimental.pallas import tpu as pltpu

_ALPHA = 0.05
_BANDWIDTH = 0.1

_LANE = 128
_SUBLANE_F32 = 8


def _round_up(a, b):
    return (a + b - 1) // b * b


def _lgk_elem(x, t, alpha, bandwidth):
    """Element-wise LGK value in f32 (shared by kernel, tail epilogue, tiny fallback)."""
    x = jnp.maximum(x.astype(jnp.float32), 1e-6)
    t = jnp.maximum(t.astype(jnp.float32), 1e-6)
    # log(x) - log(t) == log(x / t) for the clamped positive inputs.
    ratio = jnp.maximum(jnp.log(x) - jnp.log(t), 1e-6)
    d = ratio - 1.0
    norm = jnp.float32(-1.0 / (bandwidth * math.sqrt(2.0 * math.pi)))
    inv_two_bw2 = jnp.float32(1.0 / (2.0 * bandwidth * bandwidth))
    return norm * jnp.exp(-(d * d) * inv_two_bw2) + jnp.float32(alpha) * jnp.abs(d)


def _lgk_kernel(x_ref, t_ref, o_ref, *, tile_rows, rem_rows, alpha, bandwidth):
    p = pl.program_id(0)          # split axis (CORE_PARALLEL on v7x)
    t = pl.program_id(1)          # row-tile reduction axis ("arbitrary")
    last_p = pl.num_programs(0) - 1
    last_t = pl.num_programs(1) - 1

    # In-kernel f32 upcast: bf16 sources only move their narrow bytes over
    # HBM; all math is f32 on the VPU/EUP.
    val = _lgk_elem(x_ref[...], t_ref[...], alpha, bandwidth)

    def _fold(v):
        # Layout-preserving fold of (tile_rows, 128) down to one (8, 128)
        # vreg using only VPU adds; the expensive cross-lane/sublane reduce
        # happens exactly once, in the wrapper, on the tiny partials.
        return jnp.sum(
            v.reshape(tile_rows // _SUBLANE_F32, _SUBLANE_F32, _LANE), axis=0
        )[None]

    @pl.when(t == 0)
    def _():
        o_ref[...] = jnp.zeros_like(o_ref)

    if rem_rows == tile_rows:
        # Row count divides the tile: every block is full, no masking at all.
        o_ref[...] += _fold(val)
    else:
        is_last = jnp.logical_and(p == last_p, t == last_t)

        @pl.when(jnp.logical_not(is_last))
        def _():                                     # common path: mask-free
            o_ref[...] += _fold(val)

        @pl.when(is_last)
        def _():                                     # final partial block only
            row = jax.lax.broadcasted_iota(jnp.int32, val.shape, 0)
            o_ref[...] += _fold(jnp.where(row < rem_rows, val, 0.0))


def _tpu_caps():
    """(vmem_capacity_bytes, tensorcores_per_chip) with conservative fallbacks."""
    kind = ""
    try:
        kind = jax.devices()[0].device_kind.lower()
    except Exception:
        pass
    is_v7 = ("v7" in kind) or ("7x" in kind)
    vmem_cap = None
    try:
        vmem_cap = getattr(pltpu.get_tpu_info(), "vmem_capacity_bytes", None)
    except Exception:
        vmem_cap = None
    if not isinstance(vmem_cap, int) or vmem_cap <= 0:
        vmem_cap = (64 << 20) if is_v7 else (128 << 20)
    cores = 2 if is_v7 else 1     # v7x: 2 TensorCores/chip; v5e/v6e: 1
    return vmem_cap, cores


def lgk_loss(inputs, targets, *, alpha=_ALPHA, bandwidth=_BANDWIDTH,
             max_tile_rows=None):
    """Pallas equivalent of LGK_LossFunction.forward(inputs, targets)."""
    assert inputs.shape == targets.shape
    total = math.prod(inputs.shape)
    assert total > 0

    vmem_cap, cores = _tpu_caps()
    itemsize = jnp.dtype(inputs.dtype).itemsize
    # Native packed sublane tile: 8 rows f32, 16 bf16, 32 int8/fp8.
    sub = max(_SUBLANE_F32, 32 // max(itemsize, 1))

    # Degenerate tiny tensors: not even one dtype-native (sub, 128) tile of
    # data -- a kernel launch buys nothing, reduce directly in jnp.
    if total < sub * _LANE:
        vals = _lgk_elem(inputs.reshape(-1), targets.reshape(-1), alpha, bandwidth)
        return jnp.sum(vals) / jnp.float32(total)

    # Generation-gated tile / VMEM budget (v7x has 64 MiB VMEM per TC).
    big_vmem = vmem_cap >= (100 << 20)
    vmem_limit = (64 << 20) if big_vmem else (40 << 20)
    if max_tile_rows is None:
        max_tile_rows = 16384 if big_vmem else 8192
    max_tile_rows = _round_up(max(int(max_tile_rows), sub), sub)
    # 2 inputs x double buffering = 4 resident tiles; leave compiler headroom.
    budget_rows = (vmem_limit - (8 << 20)) // (4 * _LANE * itemsize)
    budget_rows = max(sub, budget_rows // sub * sub)
    max_tile_rows = min(max_tile_rows, budget_rows)

    # Largest (sub * 128)-aligned prefix streams through the kernel with no
    # copy (pure reshape); the <sub*128-element ragged tail is folded in with
    # a tiny jnp epilogue.  This removes the old full-array jnp.pad copy.
    chunk = sub * _LANE
    aligned = (total // chunk) * chunk
    rows = aligned // _LANE

    x_flat = inputs.reshape(-1)
    t_flat = targets.reshape(-1)
    if aligned == total:
        x2d = x_flat.reshape(rows, _LANE)
        t2d = t_flat.reshape(rows, _LANE)
        tail_sum = jnp.float32(0.0)
    else:
        x2d = x_flat[:aligned].reshape(rows, _LANE)
        t2d = t_flat[:aligned].reshape(rows, _LANE)
        tail_sum = jnp.sum(
            _lgk_elem(x_flat[aligned:], t_flat[aligned:], alpha, bandwidth))

    tile_rows = min(max_tile_rows, rows)            # rows % sub == 0 => tile <= rows
    num_blocks = pl.cdiv(rows, tile_rows)
    rem_rows = rows - (num_blocks - 1) * tile_rows  # valid rows in the last block

    # v7x: shard the row blocks across both TensorCores (CORE_PARALLEL).
    # Single-TC chips keep one split (no padding, no serialized split loop).
    num_splits = cores if (cores > 1 and num_blocks % cores == 0) else 1

    kernel = functools.partial(_lgk_kernel, tile_rows=tile_rows,
                               rem_rows=rem_rows, alpha=alpha,
                               bandwidth=bandwidth)

    # Mem-/EUP-bound elementwise reduction: zero MXU work.
    cost = pl.CostEstimate(
        flops=10 * total,
        transcendentals=3 * total,                    # 2x log + 1x exp
        bytes_accessed=2 * aligned * itemsize
        + num_splits * _SUBLANE_F32 * _LANE * 4,
    )

    def _call(n_splits, steps, semantics):
        return pl.pallas_call(
            kernel,
            out_shape=jax.ShapeDtypeStruct(
                (n_splits, _SUBLANE_F32, _LANE), jnp.float32),
            grid_spec=pltpu.PrefetchScalarGridSpec(
                num_scalar_prefetch=0,
                grid=(n_splits, steps),
                in_specs=[
                    # Default double-buffering; bump to pl.Buffered(3) only
                    # if xprof shows exposed per-step DMA at this tile size.
                    pl.BlockSpec((tile_rows, _LANE),
                                 lambda p, t: (p * steps + t, 0)),
                    pl.BlockSpec((tile_rows, _LANE),
                                 lambda p, t: (p * steps + t, 0)),
                ],
                out_specs=pl.BlockSpec((1, _SUBLANE_F32, _LANE),
                                       lambda p, t: (p, 0, 0)),
            ),
            compiler_params=pltpu.CompilerParams(
                dimension_semantics=semantics,
                vmem_limit_bytes=vmem_limit,
            ),
            cost_estimate=cost,
        )(x2d, t2d)

    if num_splits > 1:
        try:
            partials = _call(num_splits, num_blocks // num_splits,
                             (pltpu.CORE_PARALLEL, pltpu.ARBITRARY))
        except Exception:
            # TODO(synk): CORE_PARALLEL rejected on this chip/runtime; fall
            # back to a single serial split (correct, just not 2-TC sharded).
            partials = _call(1, num_blocks, (pltpu.ARBITRARY, pltpu.ARBITRARY))
    else:
        partials = _call(1, num_blocks, (pltpu.ARBITRARY, pltpu.ARBITRARY))

    # Single cross-lane/sublane reduce over the tiny (num_splits, 8, 128)
    # partial accumulators, plus the ragged tail, then the mean.
    return (jnp.sum(partials) + tail_sum) / jnp.float32(total)


def _reference(inputs, targets, alpha=_ALPHA, bandwidth=_BANDWIDTH):
    # Pure-JAX reference mirroring the PyTorch module exactly.
    t = jnp.maximum(targets.astype(jnp.float32), 1e-6)
    x = jnp.maximum(inputs.astype(jnp.float32), 1e-6)
    ratio = jnp.maximum(jnp.log(x / t), 1e-6)
    norm = -1.0 / (bandwidth * math.sqrt(2.0 * math.pi))
    gk = norm * jnp.exp(-((ratio - 1.0) ** 2) / (2.0 * bandwidth ** 2))
    leak = alpha * jnp.abs(ratio - 1.0)
    return jnp.mean(gk + leak)


if __name__ == "__main__":
    key = jax.random.PRNGKey(0)
    k1, k2, k3, k4 = jax.random.split(key, 4)

    # NCHW, positive-ish values like a regression output / target.
    shape = (2, 4, 16, 16)
    inputs = jax.random.uniform(k1, shape, jnp.float32, minval=0.01, maxval=2.0)
    targets = jax.random.uniform(k2, shape, jnp.float32, minval=0.01, maxval=2.0)

    loss = jax.block_until_ready(lgk_loss(inputs, targets))
    ref = jax.block_until_ready(_reference(inputs, targets))
    assert jnp.allclose(loss, ref, rtol=1e-5, atol=3e-5), (loss, ref)

    # Ragged element count -> aligned-prefix kernel + tiny jnp tail epilogue.
    rg_shape = (3, 5, 7, 11)
    rg_in = jax.random.uniform(k3, rg_shape, jnp.float32, minval=0.01, maxval=2.0)
    rg_tg = jax.random.uniform(k4, rg_shape, jnp.float32, minval=0.01, maxval=2.0)
    loss2 = jax.block_until_ready(lgk_loss(rg_in, rg_tg))
    ref2 = jax.block_until_ready(_reference(rg_in, rg_tg))
    assert jnp.allclose(loss2, ref2, rtol=1e-5, atol=3e-5), (loss2, ref2)

    # Force multiple full tiles -> exercises multi-step accumulation (and the
    # CORE_PARALLEL 2-way split on v7x).
    loss3 = jax.block_until_ready(lgk_loss(inputs, targets, max_tile_rows=8))
    assert jnp.allclose(loss3, ref, rtol=1e-5, atol=3e-5), (loss3, ref)

    # rows % tile_rows != 0 -> exercises the partial trailing block and the
    # final-step-only row mask.
    shape4 = (3, 4, 16, 16)   # 3072 elems = 24 rows of 128, tile of 16 rows
    in4 = jax.random.uniform(k1, shape4, jnp.float32, minval=0.01, maxval=2.0)
    tg4 = jax.random.uniform(k2, shape4, jnp.float32, minval=0.01, maxval=2.0)
    loss4 = jax.block_until_ready(lgk_loss(in4, tg4, max_tile_rows=16))
    ref4 = jax.block_until_ready(_reference(in4, tg4))
    assert jnp.allclose(loss4, ref4, rtol=1e-5, atol=3e-5), (loss4, ref4)

    # bf16 inputs -> dtype-native sublane tile (16) + in-kernel f32 upcast.
    loss5 = jax.block_until_ready(
        lgk_loss(inputs.astype(jnp.bfloat16), targets.astype(jnp.bfloat16)))
    ref5 = jax.block_until_ready(
        _reference(inputs.astype(jnp.bfloat16), targets.astype(jnp.bfloat16)))
    assert jnp.allclose(loss5, ref5, rtol=1e-5, atol=3e-5), (loss5, ref5)

    print("KERNEL_OK")
</pallas_src>

<mosaic_0001>
module attributes {stable_mosaic.version = 11 : i64} {
  func.func @_lgk_kernel(%arg0: i32, %arg1: i32, %arg2: memref<16x128xf32, #tpu.memory_space<vmem>>, %arg3: memref<16x128xf32, #tpu.memory_space<vmem>>, %arg4: memref<1x8x128xf32, #tpu.memory_space<vmem>>) attributes {dimension_semantics = [#tpu.dimension_semantics<arbitrary>, #tpu.dimension_semantics<arbitrary>], iteration_bounds = array<i64: 1, 1>, scalar_prefetch = 0 : i64, scratch_operands = 0 : i64, tpu.core_type = #tpu.core_type<tc>, window_params = [{transform_indices = @transform_0, window_bounds = array<i64: 16, 128>}, {transform_indices = @transform_1, window_bounds = array<i64: 16, 128>}, {transform_indices = @transform_2, window_bounds = array<i64: 1, 8, 128>}]} {
    %c0 = arith.constant 0 : index
    %c0_0 = arith.constant 0 : index
    %0 = vector.load %arg2[%c0, %c0_0] : memref<16x128xf32, #tpu.memory_space<vmem>>, vector<16x128xf32>
    %c0_1 = arith.constant 0 : index
    %c0_2 = arith.constant 0 : index
    %1 = vector.load %arg3[%c0_1, %c0_2] : memref<16x128xf32, #tpu.memory_space<vmem>>, vector<16x128xf32>
    %cst = arith.constant 9.99999997E-7 : f32
    %2 = vector.broadcast %cst : f32 to vector<16x128xf32>
    %3 = arith.maximumf %0, %2 : vector<16x128xf32>
    %cst_3 = arith.constant 9.99999997E-7 : f32
    %4 = vector.broadcast %cst_3 : f32 to vector<16x128xf32>
    %5 = arith.maximumf %1, %4 : vector<16x128xf32>
    %6 = math.log %3 : vector<16x128xf32>
    %7 = math.log %5 : vector<16x128xf32>
    %8 = arith.subf %6, %7 : vector<16x128xf32>
    %cst_4 = arith.constant 9.99999997E-7 : f32
    %9 = vector.broadcast %cst_4 : f32 to vector<16x128xf32>
    %10 = arith.maximumf %8, %9 : vector<16x128xf32>
    %cst_5 = arith.constant 1.000000e+00 : f32
    %11 = vector.broadcast %cst_5 : f32 to vector<16x128xf32>
    %12 = arith.subf %10, %11 : vector<16x128xf32>
    %13 = arith.mulf %12, %12 : vector<16x128xf32>
    %cst_6 = arith.constant 0.000000e+00 : f32
    %14 = vector.broadcast %cst_6 : f32 to vector<16x128xf32>
    %15 = arith.subf %14, %13 : vector<16x128xf32>
    %cst_7 = arith.constant 5.000000e+01 : f32
    %16 = vector.broadcast %cst_7 : f32 to vector<16x128xf32>
    %17 = arith.mulf %15, %16 : vector<16x128xf32>
    %18 = math.exp %17 : vector<16x128xf32>
    %cst_8 = arith.constant -3.9894228 : f32
    %19 = vector.broadcast %cst_8 : f32 to vector<16x128xf32>
    %20 = arith.mulf %19, %18 : vector<16x128xf32>
    %21 = math.absf %12 : vector<16x128xf32>
    %cst_9 = arith.constant 5.000000e-02 : f32
    %22 = vector.broadcast %cst_9 : f32 to vector<16x128xf32>
    %23 = arith.mulf %22, %21 : vector<16x128xf32>
    %24 = arith.addf %20, %23 : vector<16x128xf32>
    %c0_i32 = arith.constant 0 : i32
    %25 = arith.cmpi eq, %arg1, %c0_i32 : i32
    %26 = arith.extui %25 : i1 to i32
    %c0_i32_10 = arith.constant 0 : i32
    %27 = arith.cmpi ne, %26, %c0_i32_10 : i32
    scf.if %27 {
      %cst_18 = arith.constant 0.000000e+00 : f32
      %34 = vector.broadcast %cst_18 : f32 to vector<1x8x128xf32>
      %c0_19 = arith.constant 0 : index
      %c0_20 = arith.constant 0 : index
      %c0_21 = arith.constant 0 : index
      %35 = vector.load %arg4[%c0_19, %c0_20, %c0_21] : memref<1x8x128xf32, #tpu.memory_space<vmem>>, vector<1x8x128xf32>
      tpu.vector_store %arg4[%c0_19, %c0_20, %c0_21], %34 {strides = array<i32>} : memref<1x8x128xf32, #tpu.memory_space<vmem>>, vector<1x8x128xf32>,
    } else {
    }
    %c0_11 = arith.constant 0 : index
    %c0_12 = arith.constant 0 : index
    %c0_13 = arith.constant 0 : index
    %28 = vector.load %arg4[%c0_11, %c0_12, %c0_13] : memref<1x8x128xf32, #tpu.memory_space<vmem>>, vector<1x8x128xf32>
    %29 = vector.shape_cast %24 : vector<16x128xf32> to vector<2x8x128xf32>
    %cst_14 = arith.constant dense<0.000000e+00> : vector<8x128xf32>
    %30 = vector.multi_reduction <add>, %29, %cst_14 [0] : vector<2x8x128xf32> to vector<8x128xf32>
    %31 = vector.shape_cast %30 : vector<8x128xf32> to vector<1x8x128xf32>
    %32 = arith.addf %28, %31 : vector<1x8x128xf32>
    %c0_15 = arith.constant 0 : index
    %c0_16 = arith.constant 0 : index
    %c0_17 = arith.constant 0 : index
    %33 = vector.load %arg4[%c0_15, %c0_16, %c0_17] : memref<1x8x128xf32, #tpu.memory_space<vmem>>, vector<1x8x128xf32>
    tpu.vector_store %arg4[%c0_15, %c0_16, %c0_17], %32 {strides = array<i32>} : memref<1x8x128xf32, #tpu.memory_space<vmem>>, vector<1x8x128xf32>,
    return
  }
  func.func @transform_0(%arg0: i32, %arg1: i32) -> (i32, i32) {
    %c1_i32 = arith.constant 1 : i32
    %0 = arith.muli %arg0, %c1_i32 : i32
    %1 = arith.addi %0, %arg1 : i32
    %c0_i32 = arith.constant 0 : i32
    %c0_i32_0 = arith.constant 0 : i32
    return %1, %c0_i32 : i32, i32
  }
  func.func @transform_1(%arg0: i32, %arg1: i32) -> (i32, i32) {
    %c1_i32 = arith.constant 1 : i32
    %0 = arith.muli %arg0, %c1_i32 : i32
    %1 = arith.addi %0, %arg1 : i32
    %c0_i32 = arith.constant 0 : i32
    %c0_i32_0 = arith.constant 0 : i32
    return %1, %c0_i32 : i32, i32
  }
  func.func @transform_2(%arg0: i32, %arg1: i32) -> (i32, i32, i32) {
    %c0_i32 = arith.constant 0 : i32
    %c0_i32_0 = arith.constant 0 : i32
    %c0_i32_1 = arith.constant 0 : i32
    return %arg0, %c0_i32, %c0_i32_0 : i32, i32, i32
  }
}

</mosaic_0001>

<bundles_post_ra>
// kernel: tpu_custom_call.1
= control target key start
LH: loop header
LB: loop body
LE: loop exit
PB: predicated region body
PF: predicated region fallthrough
CT: control target
= control target key end

     0   :  { %7 = vsyncpa [#allocation3], 0  ;;  %s265_s0 = inlined_call_operand.hbm [shape: f32[16,128], index: 0, kind: input, shape index: {}]   ;;  %s266_s1 = inlined_call_operand.hbm [shape: f32[16,128], index: 1, kind: input, shape index: {}]   ;;  %s267_s2 = inlined_call_operand.hbm [shape: f32[1,8,128], index: 2, kind: output, shape index: {}]  }
   0x1   :  { %8 = vsyncpa [#allocation6], 0 }
   0x2   :  { %9 = vsyncpa [#allocation4], 0  ;;  %s209_s9 = smov [#allocation2]   ;;  %s137_s13 = scalar_lea.hbm %s265_s0, 256 }
   0x3   :  { %s19_s10 = sshll.u32 %s209_s9, 4  ;;  %p138_p0 = scmp.ne.s32.totalorder %s265_s0, %s137_s13  ;;  %s20_s10 = int_to_ptr.vmem [resolvable:$true] %s19_s10 }
   0x4   :  { %p141_p1 = scmp.lt.u32.totalorder %s137_s13, %s265_s0 }
   0x6   :  { %p143_p2 = pnand %p141_p1, %p138_p0 }
   0x8   :  { %146 = shalt.err (!%p143_p2)
}
   0x9   :  { %s147_s18 = scalar_lea.vmem %s20_s10, 256  ;;  %p152_p4 = scmp.lt.s32.totalorder %s20_s10, %s20_s10 }
   0xa   :  { %p148_p3 = scmp.ne.s32.totalorder %s20_s10, %s147_s18  ;;  %p153_p5 = scmp.lt.s32.totalorder %s147_s18, %s147_s18 }
   0xc   :  { %p154_p6 = por %p153_p5, %p152_p4 }
   0xe   :  { %p155_p7 = pnand %p154_p6, %p148_p3 }
  0x10   :  { %158 = shalt.err (!%p155_p7)
}
  0x11   :  { %s210_s19 = smov 128   ;;  %s211_s20 = smov 8  }
  0x12   :  { %25 = dma.hbm_to_vmem [thread:$0]  %s265_s0, 256, %s20_s10, [#allocation3], %s210_s19, %s210_s19, %s211_s20  }
  0x13   :  { %s212_s23 = smov [#allocation5]   ;;  %s159_s27 = scalar_lea.hbm %s266_s1, 256 }
  0x14   :  { %s35_s24 = sshll.u32 %s212_s23, 4  ;;  %p160_p8 = scmp.ne.s32.totalorder %s266_s1, %s159_s27  ;;  %s36_s24 = int_to_ptr.vmem [resolvable:$true] %s35_s24 }
  0x15   :  { %p163_p9 = scmp.lt.u32.totalorder %s159_s27, %s266_s1 }
  0x17   :  { %p165_p10 = pnand %p163_p9, %p160_p8 }
  0x19   :  { %168 = shalt.err (!%p165_p10)
}
  0x1a   :  { %s169_s4 = scalar_lea.vmem %s36_s24, 256  ;;  %p174_p12 = scmp.lt.s32.totalorder %s36_s24, %s36_s24 }
  0x1b   :  { %p170_p11 = scmp.ne.s32.totalorder %s36_s24, %s169_s4  ;;  %p175_p13 = scmp.lt.s32.totalorder %s169_s4, %s169_s4 }
  0x1d   :  { %p176_p0 = por %p175_p13, %p174_p12 }
  0x1f   :  { %p177_p1 = pnand %p176_p0, %p170_p11 }
  0x21   :  { %180 = shalt.err (!%p177_p1)
}
  0x22   :  { %41 = dma.hbm_to_vmem [thread:$0]  %s266_s1, 256, %s36_s24, [#allocation6], %s210_s19, %s210_s19, %s211_s20  }
  0x23   :  { %203 = dma.done.wait [#allocation3], 256  }
  0x24   :  { %204 = vsyncadd [#allocation3], 4294967040 }
  0x25   :  { %205 = dma.done.wait [#allocation6], 256  }
  0x26   :  { %206 = vsyncadd [#allocation6], 4294967040  ;;  %v52_v0 = vld [vmem:[#allocation2] sm:$0xff]  ;;  %v53_v1 = vld [vmem:[#allocation2 + $0x8] sm:$0xff]  ;;  %s213_s1 = smov [#allocation7]  }
  0x27   :  { %v54_v2 = vld [vmem:[#allocation5] sm:$0xff]  ;;  %v55_v3 = vld [vmem:[#allocation5 + $0x8] sm:$0xff]  ;;  %v56_v4 = vmax.f32 %v52_v0, 1e-06  ;;  %v57_v5 = vmax.f32 %v53_v1, 1e-06 }
  0x28   :  { %v58_v6 = vmax.f32 %v54_v2, 1e-06  ;;  %v59_v7 = vmax.f32 %v55_v3, 1e-06  ;;  %s107_s6 = sshll.u32 %s213_s1, 4  ;;  %s108_s6 = int_to_ptr.vmem [resolvable:$true] %s107_s6 }
  0x29   :  { %125 = vlog2.f32 %v56_v4  ;;  %s181_s7 = scalar_lea.vmem %s108_s6, 128  ;;  %p186_p3 = scmp.lt.s32.totalorder %s108_s6, %s108_s6 }
  0x2a   :  { %127 = vlog2.f32 %v57_v5  ;;  %p182_p2 = scmp.ne.s32.totalorder %s108_s6, %s181_s7  ;;  %p187_p4 = scmp.lt.s32.totalorder %s181_s7, %s181_s7 }
  0x2b   :  { %129 = vlog2.f32 %v58_v6 }
  0x2c   :  { %131 = vlog2.f32 %v59_v7  ;;  %p188_p5 = por %p187_p4, %p186_p3 }
  0x2e   :  { %p189_p6 = pnand %p188_p5, %p182_p2 }
  0x33   :  { %v126_v8 = vpop.eup %125 }
  0x34   :  { %v128_v9 = vpop.eup %127  ;;  %v61_v10 = vmul.f32 0.6931472, %v126_v8 }
  0x35   :  { %v130_v11 = vpop.eup %129  ;;  %v63_v12 = vmul.f32 0.6931472, %v128_v9 }
  0x36   :  { %v132_v13 = vpop.eup %131  ;;  %v65_v14 = vmul.f32 0.6931472, %v130_v11 }
  0x37   :  { %v67_v15 = vmul.f32 0.6931472, %v132_v13 }
  0x38   :  { %v68_v16 = vsub.f32 %v61_v10, %v65_v14 }
  0x39   :  { %v69_v17 = vsub.f32 %v63_v12, %v67_v15 }
  0x3a   :  { %v70_v18 = vmax.f32 %v68_v16, 1e-06 }
  0x3b   :  { %v71_v19 = vmax.f32 %v69_v17, 1e-06 }
  0x3c   :  { %v117_v20 = vadd.f32 -1.0, %v70_v18 }
  0x3d   :  { %v118_v21 = vadd.f32 -1.0, %v71_v19 }
  0x3e   :  { %v74_v22 = vmul.f32 %v117_v20, %v117_v20  ;;  %v86_v30 = vand.u32 2147483647, %v117_v20 }
  0x3f   :  { %v75_v23 = vmul.f32 %v118_v21, %v118_v21  ;;  %v87_v31 = vand.u32 2147483647, %v118_v21 }
  0x40   :  { %v76_v24 = vsub.f32 0.0, %v74_v22  ;;  %v88_v32 = vmul.f32 0.05, %v86_v30 }
  0x41   :  { %v77_v25 = vsub.f32 0.0, %v75_v23  ;;  %v89_v34 = vmul.f32 0.05, %v87_v31 }
  0x42   :  { %v78_v26 = vmul.f32 50.0, %v76_v24 }
  0x43   :  { %v79_v27 = vmul.f32 50.0, %v77_v25 }
  0x44   :  { %v80_v28 = vmul.f32 1.442695, %v78_v26 }
  0x45   :  { %v82_v29 = vmul.f32 1.442695, %v79_v27 }
  0x46   :  { %133 = vpow2.f32 %v80_v28 }
  0x47   :  { %135 = vpow2.f32 %v82_v29 }
  0x50   :  { %v134_v33 = vpop.eup %133 }
  0x51   :  { %v136_v35 = vpop.eup %135  ;;  %v84_v36 = vmul.f32 -3.9894228, %v134_v33 }
  0x52   :  { %v85_v37 = vmul.f32 -3.9894228, %v136_v35 }
  0x53   :  { %v90_v38 = vadd.f32 %v88_v32, %v84_v36 }
  0x54   :  { %v91_v39 = vadd.f32 %v89_v34, %v85_v37 }
  0x56   :  { %v98_v40 = vadd.f32 %v91_v39, %v90_v38 }
  0x58   :  { %100 = vst [vmem:[#allocation7] sm:$0xff] %v98_v40 }
  0x59   :  { %192 = shalt.err (!%p189_p6)
}
  0x5a   :  { %s193_s10 = scalar_lea.hbm %s267_s2, 128 }
  0x5b   :  { %p194_p7 = scmp.ne.s32.totalorder %s267_s2, %s193_s10  ;;  %p197_p8 = scmp.lt.u32.totalorder %s193_s10, %s267_s2 }
  0x5d   :  { %p199_p9 = pnand %p197_p8, %p194_p7 }
  0x5f   :  { %202 = shalt.err (!%p199_p9)
}
  0x60   :  { %110 = dma.vmem_to_hbm [thread:$0]  %s108_s6, 128, %s267_s2, [#allocation4]  }
  0x61   :  { %207 = dma.done.wait [#allocation4], 128  }
  0x62   :  { %208 = vsyncadd [#allocation4], 4294967168 }
  0x63   :  { %114 = vsyncpa [#allocation3], 1 }
  0x64   :  { %115 = vsyncpa [#allocation6], 1 }
  0x65   :  { %116 = vsyncpa [#allocation4], 1 }

</bundles_post_ra>
